<compile_context>
chip_gen: v5e
topology: v5e:2x2
jax: 0.10.0
libtpu: 0.0.40
codegen_flags: <defaults>
</compile_context>

<pallas_src>
import jax
import jax.numpy as jnp
from jax import lax
from jax.experimental import pallas as pl
from jax.experimental.pallas import tpu as pltpu

_TAPS = tuple((dh, dw) for dh in (-1, 0, 1) for dw in (-1, 0, 1))
_CENTER = _TAPS.index((0, 0))


def _make_g2_kernel(C1, Cm, Co, H, W):
    HW = H * W

    def kernel(x_ref, mask_ref, w1d_ref, b1d_ref, w1p_ref, b1p_ref,
               w2d_ref, b2d_ref, w2p_ref, b2p_ref, o_ref):
        # x_ref:    (1, C1, HW)   one batch element (grid iterates over N)
        # mask_ref: (9, 1, HW)    f32 validity mask per tap (host-precomputed)
        # w*d_ref:  (9, C, 1)     depthwise weight columns (lane-broadcast)
        # b*d_ref:  (C, 1)        depthwise bias columns
        # w*p_ref:  (Cout, Cin)   pointwise weights (VMEM -> MXU)
        # b*p_ref:  (Cout, 1)     pointwise bias columns
        # o_ref:    (1, Co, HW)

        def depthwise_relu(slab, wcol_ref, bcol_ref):
            # slab: (C, HW) f32.  Per tap: XLU lane roll + 2 vmul + 1 vadd.
            acc = slab * wcol_ref[_CENTER]           # center tap: no roll, no mask
            for t, (dh, dw) in enumerate(_TAPS):
                if (dh, dw) == (0, 0):
                    continue
                s = dh * W + dw
                shifted = pltpu.roll(slab, (-s) % HW, axis=1)        # XLU
                acc = acc + (shifted * mask_ref[t]) * wcol_ref[t]    # VPU
            return jnp.maximum(acc + bcol_ref[...], 0.0)

        def pointwise_relu(slab, wp_ref, bp_ref):
            # (Cin, HW) -> (Cout, HW) on the MXU.
            z = jnp.dot(wp_ref[...], slab, preferred_element_type=jnp.float32)
            return jnp.maximum(z + bp_ref[...], 0.0)

        x = x_ref[0].astype(jnp.float32)                     # (C1, HW)
        y1 = depthwise_relu(x, w1d_ref, b1d_ref)             # (C1, HW)
        m1 = pointwise_relu(y1, w1p_ref, b1p_ref)            # (Cm, HW)
        y2 = depthwise_relu(m1, w2d_ref, b2d_ref)            # (Cm, HW)
        o = pointwise_relu(y2, w2p_ref, b2p_ref)             # (Co, HW)
        o_ref[0] = o.astype(o_ref.dtype)

    return kernel


def g2_encoder_block(x, dw1_w, dw1_b, pw1_w, pw1_b, dw2_w, dw2_b, pw2_w, pw2_b):
    """_G2EncoderBlock.forward (is_last_block=True).  x: (N, Cin, H, W) f32."""
    N, C1, H, W = x.shape
    Cm = pw1_w.shape[0]
    Co = pw2_w.shape[0]
    HW = H * W

    # Zero-copy view: NCHW -> (N, C, H*W). No transpose, no pad.
    x_slab = x.reshape(N, C1, HW)

    # Host-precomputed padding=1 validity masks, one per tap (tiny: 9*HW f32).
    pos = jnp.arange(HW, dtype=jnp.int32)
    row, col = pos // W, pos % W
    mask = jnp.stack([
        ((row + dh >= 0) & (row + dh < H) &
         (col + dw >= 0) & (col + dw < W)).astype(jnp.float32)
        for dh, dw in _TAPS
    ]).reshape(9, 1, HW)

    # Depthwise weights as (9, C, 1) broadcast columns; biases as (C, 1).
    w1d = dw1_w.reshape(C1, 9).T.reshape(9, C1, 1).astype(jnp.float32)
    b1d = dw1_b.reshape(C1, 1).astype(jnp.float32)
    w2d = dw2_w.reshape(Cm, 9).T.reshape(9, Cm, 1).astype(jnp.float32)
    b2d = dw2_b.reshape(Cm, 1).astype(jnp.float32)

    # Pointwise weights/biases as VMEM tiles feeding the MXU.
    w1p = pw1_w.reshape(Cm, C1).astype(jnp.float32)
    b1p = pw1_b.reshape(Cm, 1).astype(jnp.float32)
    w2p = pw2_w.reshape(Co, Cm).astype(jnp.float32)
    b2p = pw2_b.reshape(Co, 1).astype(jnp.float32)

    flops = N * HW * 2 * (9 * C1 + Cm * C1 + 9 * Cm + Co * Cm)
    bytes_accessed = 4 * (N * C1 * HW + N * Co * HW + 9 * HW
                          + 9 * (C1 + Cm) + (C1 + 2 * Cm)
                          + Cm * C1 + Co * Cm + Cm + Co)

    out_slab = pl.pallas_call(
        _make_g2_kernel(C1, Cm, Co, H, W),
        out_shape=jax.ShapeDtypeStruct((N, Co, HW), x.dtype),
        grid_spec=pltpu.PrefetchScalarGridSpec(
            num_scalar_prefetch=0,
            grid=(N,),  # one batch element per step; "parallel" -> 2 TCs on v7x
            in_specs=[
                pl.BlockSpec((1, C1, HW), lambda n: (n, 0, 0)),    # x (per batch)
                pl.BlockSpec((9, 1, HW), lambda n: (0, 0, 0)),     # tap masks
                pl.BlockSpec((9, C1, 1), lambda n: (0, 0, 0)),     # dw1 w cols
                pl.BlockSpec((C1, 1), lambda n: (0, 0)),           # dw1 b col
                pl.BlockSpec((Cm, C1), lambda n: (0, 0)),          # pw1 w (VMEM)
                pl.BlockSpec((Cm, 1), lambda n: (0, 0)),           # pw1 b col
                pl.BlockSpec((9, Cm, 1), lambda n: (0, 0, 0)),     # dw2 w cols
                pl.BlockSpec((Cm, 1), lambda n: (0, 0)),           # dw2 b col
                pl.BlockSpec((Co, Cm), lambda n: (0, 0)),          # pw2 w (VMEM)
                pl.BlockSpec((Co, 1), lambda n: (0, 0)),           # pw2 b col
            ],
            out_specs=pl.BlockSpec((1, Co, HW), lambda n: (n, 0, 0)),
        ),
        compiler_params=pltpu.CompilerParams(
            dimension_semantics=("parallel",),
            vmem_limit_bytes=32 * 1024 * 1024),
        cost_estimate=pl.CostEstimate(flops=flops, transcendentals=0,
                                      bytes_accessed=bytes_accessed),
    )(x_slab, mask, w1d, b1d, w1p, b1p, w2d, b2d, w2p, b2p)

    out = out_slab.reshape(N, Co, H, W)
    # TODO(synk): is_last_block=False branch (extra stride-2 DepthwiseSeparableConv
    # `self.conv`) is not implemented; the module default (is_last_block=True)
    # returns the same tensor twice, which is what we do here.
    return out, out


def _dsc_reference(x, dw_w, dw_b, pw_w, pw_b):
    """Pure-JAX reference for one DepthwiseSeparableConv (ReLU activations)."""
    C = x.shape[1]
    dn = lax.conv_dimension_numbers(x.shape, dw_w.shape, ("NCHW", "OIHW", "NCHW"))
    y = lax.conv_general_dilated(x, dw_w, window_strides=(1, 1),
                                 padding=((1, 1), (1, 1)),
                                 dimension_numbers=dn, feature_group_count=C)
    y = jnp.maximum(y + dw_b.reshape(1, C, 1, 1), 0.0)
    dn2 = lax.conv_dimension_numbers(y.shape, pw_w.shape, ("NCHW", "OIHW", "NCHW"))
    z = lax.conv_general_dilated(y, pw_w, window_strides=(1, 1),
                                 padding=((0, 0), (0, 0)), dimension_numbers=dn2)
    return jnp.maximum(z + pw_b.reshape(1, -1, 1, 1), 0.0)


if __name__ == "__main__":
    N, Cin, H, W = 2, 4, 16, 16
    Cmid = Cout = 8  # _G2EncoderBlock(in_channels=4, out_channels=8)

    key = jax.random.PRNGKey(0)
    ks = jax.random.split(key, 9)
    x = jax.random.normal(ks[0], (N, Cin, H, W), jnp.float32)
    dw1_w = jax.random.normal(ks[1], (Cin, 1, 3, 3), jnp.float32) * 0.2
    dw1_b = jax.random.normal(ks[2], (Cin,), jnp.float32) * 0.1
    pw1_w = jax.random.normal(ks[3], (Cmid, Cin, 1, 1), jnp.float32) * 0.2
    pw1_b = jax.random.normal(ks[4], (Cmid,), jnp.float32) * 0.1
    dw2_w = jax.random.normal(ks[5], (Cmid, 1, 3, 3), jnp.float32) * 0.2
    dw2_b = jax.random.normal(ks[6], (Cmid,), jnp.float32) * 0.1
    pw2_w = jax.random.normal(ks[7], (Cout, Cmid, 1, 1), jnp.float32) * 0.2
    pw2_b = jax.random.normal(ks[8], (Cout,), jnp.float32) * 0.1

    out_main, out_branch = g2_encoder_block(x, dw1_w, dw1_b, pw1_w, pw1_b,
                                            dw2_w, dw2_b, pw2_w, pw2_b)
    out_main = jax.block_until_ready(out_main)

    ref = _dsc_reference(_dsc_reference(x, dw1_w, dw1_b, pw1_w, pw1_b),
                         dw2_w, dw2_b, pw2_w, pw2_b)
    assert out_main.shape == (N, Cout, H, W)
    assert jnp.allclose(out_main, ref, atol=1e-5, rtol=1e-5), "mismatch vs reference"
    assert jnp.allclose(out_branch, ref, atol=1e-5, rtol=1e-5), "branch mismatch"

    print("KERNEL_OK")
</pallas_src>

<mosaic_0001>
module attributes {stable_mosaic.version = 11 : i64} {
  func.func @kernel(%arg0: i32, %arg1: memref<1x4x256xf32, #tpu.memory_space<vmem>>, %arg2: memref<9x1x256xf32, #tpu.memory_space<vmem>>, %arg3: memref<9x4x1xf32, #tpu.memory_space<vmem>>, %arg4: memref<4x1xf32, #tpu.memory_space<vmem>>, %arg5: memref<8x4xf32, #tpu.memory_space<vmem>>, %arg6: memref<8x1xf32, #tpu.memory_space<vmem>>, %arg7: memref<9x8x1xf32, #tpu.memory_space<vmem>>, %arg8: memref<8x1xf32, #tpu.memory_space<vmem>>, %arg9: memref<8x8xf32, #tpu.memory_space<vmem>>, %arg10: memref<8x1xf32, #tpu.memory_space<vmem>>, %arg11: memref<1x8x256xf32, #tpu.memory_space<vmem>>) attributes {dimension_semantics = [#tpu.dimension_semantics<parallel>], iteration_bounds = array<i64: 2>, scalar_prefetch = 0 : i64, scratch_operands = 0 : i64, tpu.core_type = #tpu.core_type<tc>, window_params = [{transform_indices = @transform_0, window_bounds = array<i64: 1, 4, 256>}, {pipeline_mode = #tpu.pipeline_mode<synchronous>, transform_indices = @transform_1, window_bounds = array<i64: 9, 1, 256>}, {pipeline_mode = #tpu.pipeline_mode<synchronous>, transform_indices = @transform_2, window_bounds = array<i64: 9, 4, 1>}, {pipeline_mode = #tpu.pipeline_mode<synchronous>, transform_indices = @transform_3, window_bounds = array<i64: 4, 1>}, {pipeline_mode = #tpu.pipeline_mode<synchronous>, transform_indices = @transform_4, window_bounds = array<i64: 8, 4>}, {pipeline_mode = #tpu.pipeline_mode<synchronous>, transform_indices = @transform_5, window_bounds = array<i64: 8, 1>}, {pipeline_mode = #tpu.pipeline_mode<synchronous>, transform_indices = @transform_6, window_bounds = array<i64: 9, 8, 1>}, {pipeline_mode = #tpu.pipeline_mode<synchronous>, transform_indices = @transform_7, window_bounds = array<i64: 8, 1>}, {pipeline_mode = #tpu.pipeline_mode<synchronous>, transform_indices = @transform_8, window_bounds = array<i64: 8, 8>}, {pipeline_mode = #tpu.pipeline_mode<synchronous>, transform_indices = @transform_9, window_bounds = array<i64: 8, 1>}, {transform_indices = @transform_10, window_bounds = array<i64: 1, 8, 256>}]} {
    %c0 = arith.constant 0 : index
    %c0_0 = arith.constant 0 : index
    %c0_1 = arith.constant 0 : index
    %0 = vector.load %arg1[%c0, %c0_0, %c0_1] : memref<1x4x256xf32, #tpu.memory_space<vmem>>, vector<1x4x256xf32>
    %1 = vector.shape_cast %0 : vector<1x4x256xf32> to vector<4x256xf32>
    %c4 = arith.constant 4 : index
    %c0_2 = arith.constant 0 : index
    %c0_3 = arith.constant 0 : index
    %2 = vector.load %arg3[%c4, %c0_2, %c0_3] : memref<9x4x1xf32, #tpu.memory_space<vmem>>, vector<1x4x1xf32>
    %3 = vector.shape_cast %2 : vector<1x4x1xf32> to vector<4x1xf32>
    %4 = vector.broadcast %3 : vector<4x1xf32> to vector<4x256xf32>
    %5 = arith.mulf %1, %4 : vector<4x256xf32>
    %c17_i32 = arith.constant 17 : i32
    %6 = tpu.dynamic_rotate %1 by %c17_i32 dim 1 : vector<4x256xf32>, i32 -> vector<4x256xf32>
    %c0_4 = arith.constant 0 : index
    %c0_5 = arith.constant 0 : index
    %c0_6 = arith.constant 0 : index
    %7 = vector.load %arg2[%c0_4, %c0_5, %c0_6] : memref<9x1x256xf32, #tpu.memory_space<vmem>>, vector<1x1x256xf32>
    %8 = vector.shape_cast %7 : vector<1x1x256xf32> to vector<1x256xf32>
    %9 = vector.broadcast %8 : vector<1x256xf32> to vector<4x256xf32>
    %10 = arith.mulf %6, %9 : vector<4x256xf32>
    %c0_7 = arith.constant 0 : index
    %c0_8 = arith.constant 0 : index
    %c0_9 = arith.constant 0 : index
    %11 = vector.load %arg3[%c0_7, %c0_8, %c0_9] : memref<9x4x1xf32, #tpu.memory_space<vmem>>, vector<1x4x1xf32>
    %12 = vector.shape_cast %11 : vector<1x4x1xf32> to vector<4x1xf32>
    %13 = vector.broadcast %12 : vector<4x1xf32> to vector<4x256xf32>
    %14 = arith.mulf %10, %13 : vector<4x256xf32>
    %15 = arith.addf %5, %14 : vector<4x256xf32>
    %c16_i32 = arith.constant 16 : i32
    %16 = tpu.dynamic_rotate %1 by %c16_i32 dim 1 : vector<4x256xf32>, i32 -> vector<4x256xf32>
    %c1 = arith.constant 1 : index
    %c0_10 = arith.constant 0 : index
    %c0_11 = arith.constant 0 : index
    %17 = vector.load %arg2[%c1, %c0_10, %c0_11] : memref<9x1x256xf32, #tpu.memory_space<vmem>>, vector<1x1x256xf32>
    %18 = vector.shape_cast %17 : vector<1x1x256xf32> to vector<1x256xf32>
    %19 = vector.broadcast %18 : vector<1x256xf32> to vector<4x256xf32>
    %20 = arith.mulf %16, %19 : vector<4x256xf32>
    %c1_12 = arith.constant 1 : index
    %c0_13 = arith.constant 0 : index
    %c0_14 = arith.constant 0 : index
    %21 = vector.load %arg3[%c1_12, %c0_13, %c0_14] : memref<9x4x1xf32, #tpu.memory_space<vmem>>, vector<1x4x1xf32>
    %22 = vector.shape_cast %21 : vector<1x4x1xf32> to vector<4x1xf32>
    %23 = vector.broadcast %22 : vector<4x1xf32> to vector<4x256xf32>
    %24 = arith.mulf %20, %23 : vector<4x256xf32>
    %25 = arith.addf %15, %24 : vector<4x256xf32>
    %c15_i32 = arith.constant 15 : i32
    %26 = tpu.dynamic_rotate %1 by %c15_i32 dim 1 : vector<4x256xf32>, i32 -> vector<4x256xf32>
    %c2 = arith.constant 2 : index
    %c0_15 = arith.constant 0 : index
    %c0_16 = arith.constant 0 : index
    %27 = vector.load %arg2[%c2, %c0_15, %c0_16] : memref<9x1x256xf32, #tpu.memory_space<vmem>>, vector<1x1x256xf32>
    %28 = vector.shape_cast %27 : vector<1x1x256xf32> to vector<1x256xf32>
    %29 = vector.broadcast %28 : vector<1x256xf32> to vector<4x256xf32>
    %30 = arith.mulf %26, %29 : vector<4x256xf32>
    %c2_17 = arith.constant 2 : index
    %c0_18 = arith.constant 0 : index
    %c0_19 = arith.constant 0 : index
    %31 = vector.load %arg3[%c2_17, %c0_18, %c0_19] : memref<9x4x1xf32, #tpu.memory_space<vmem>>, vector<1x4x1xf32>
    %32 = vector.shape_cast %31 : vector<1x4x1xf32> to vector<4x1xf32>
    %33 = vector.broadcast %32 : vector<4x1xf32> to vector<4x256xf32>
    %34 = arith.mulf %30, %33 : vector<4x256xf32>
    %35 = arith.addf %25, %34 : vector<4x256xf32>
    %c1_i32 = arith.constant 1 : i32
    %36 = tpu.dynamic_rotate %1 by %c1_i32 dim 1 : vector<4x256xf32>, i32 -> vector<4x256xf32>
    %c3 = arith.constant 3 : index
    %c0_20 = arith.constant 0 : index
    %c0_21 = arith.constant 0 : index
    %37 = vector.load %arg2[%c3, %c0_20, %c0_21] : memref<9x1x256xf32, #tpu.memory_space<vmem>>, vector<1x1x256xf32>
    %38 = vector.shape_cast %37 : vector<1x1x256xf32> to vector<1x256xf32>
    %39 = vector.broadcast %38 : vector<1x256xf32> to vector<4x256xf32>
    %40 = arith.mulf %36, %39 : vector<4x256xf32>
    %c3_22 = arith.constant 3 : index
    %c0_23 = arith.constant 0 : index
    %c0_24 = arith.constant 0 : index
    %41 = vector.load %arg3[%c3_22, %c0_23, %c0_24] : memref<9x4x1xf32, #tpu.memory_space<vmem>>, vector<1x4x1xf32>
    %42 = vector.shape_cast %41 : vector<1x4x1xf32> to vector<4x1xf32>
    %43 = vector.broadcast %42 : vector<4x1xf32> to vector<4x256xf32>
    %44 = arith.mulf %40, %43 : vector<4x256xf32>
    %45 = arith.addf %35, %44 : vector<4x256xf32>
    %c255_i32 = arith.constant 255 : i32
    %46 = tpu.dynamic_rotate %1 by %c255_i32 dim 1 : vector<4x256xf32>, i32 -> vector<4x256xf32>
    %c5 = arith.constant 5 : index
    %c0_25 = arith.constant 0 : index
    %c0_26 = arith.constant 0 : index
    %47 = vector.load %arg2[%c5, %c0_25, %c0_26] : memref<9x1x256xf32, #tpu.memory_space<vmem>>, vector<1x1x256xf32>
    %48 = vector.shape_cast %47 : vector<1x1x256xf32> to vector<1x256xf32>
    %49 = vector.broadcast %48 : vector<1x256xf32> to vector<4x256xf32>
    %50 = arith.mulf %46, %49 : vector<4x256xf32>
    %c5_27 = arith.constant 5 : index
    %c0_28 = arith.constant 0 : index
    %c0_29 = arith.constant 0 : index
    %51 = vector.load %arg3[%c5_27, %c0_28, %c0_29] : memref<9x4x1xf32, #tpu.memory_space<vmem>>, vector<1x4x1xf32>
    %52 = vector.shape_cast %51 : vector<1x4x1xf32> to vector<4x1xf32>
    %53 = vector.broadcast %52 : vector<4x1xf32> to vector<4x256xf32>
    %54 = arith.mulf %50, %53 : vector<4x256xf32>
    %55 = arith.addf %45, %54 : vector<4x256xf32>
    %c241_i32 = arith.constant 241 : i32
    %56 = tpu.dynamic_rotate %1 by %c241_i32 dim 1 : vector<4x256xf32>, i32 -> vector<4x256xf32>
    %c6 = arith.constant 6 : index
    %c0_30 = arith.constant 0 : index
    %c0_31 = arith.constant 0 : index
    %57 = vector.load %arg2[%c6, %c0_30, %c0_31] : memref<9x1x256xf32, #tpu.memory_space<vmem>>, vector<1x1x256xf32>
    %58 = vector.shape_cast %57 : vector<1x1x256xf32> to vector<1x256xf32>
    %59 = vector.broadcast %58 : vector<1x256xf32> to vector<4x256xf32>
    %60 = arith.mulf %56, %59 : vector<4x256xf32>
    %c6_32 = arith.constant 6 : index
    %c0_33 = arith.constant 0 : index
    %c0_34 = arith.constant 0 : index
    %61 = vector.load %arg3[%c6_32, %c0_33, %c0_34] : memref<9x4x1xf32, #tpu.memory_space<vmem>>, vector<1x4x1xf32>
    %62 = vector.shape_cast %61 : vector<1x4x1xf32> to vector<4x1xf32>
    %63 = vector.broadcast %62 : vector<4x1xf32> to vector<4x256xf32>
    %64 = arith.mulf %60, %63 : vector<4x256xf32>
    %65 = arith.addf %55, %64 : vector<4x256xf32>
    %c240_i32 = arith.constant 240 : i32
    %66 = tpu.dynamic_rotate %1 by %c240_i32 dim 1 : vector<4x256xf32>, i32 -> vector<4x256xf32>
    %c7 = arith.constant 7 : index
    %c0_35 = arith.constant 0 : index
    %c0_36 = arith.constant 0 : index
    %67 = vector.load %arg2[%c7, %c0_35, %c0_36] : memref<9x1x256xf32, #tpu.memory_space<vmem>>, vector<1x1x256xf32>
    %68 = vector.shape_cast %67 : vector<1x1x256xf32> to vector<1x256xf32>
    %69 = vector.broadcast %68 : vector<1x256xf32> to vector<4x256xf32>
    %70 = arith.mulf %66, %69 : vector<4x256xf32>
    %c7_37 = arith.constant 7 : index
    %c0_38 = arith.constant 0 : index
    %c0_39 = arith.constant 0 : index
    %71 = vector.load %arg3[%c7_37, %c0_38, %c0_39] : memref<9x4x1xf32, #tpu.memory_space<vmem>>, vector<1x4x1xf32>
    %72 = vector.shape_cast %71 : vector<1x4x1xf32> to vector<4x1xf32>
    %73 = vector.broadcast %72 : vector<4x1xf32> to vector<4x256xf32>
    %74 = arith.mulf %70, %73 : vector<4x256xf32>
    %75 = arith.addf %65, %74 : vector<4x256xf32>
    %c239_i32 = arith.constant 239 : i32
    %76 = tpu.dynamic_rotate %1 by %c239_i32 dim 1 : vector<4x256xf32>, i32 -> vector<4x256xf32>
    %c8 = arith.constant 8 : index
    %c0_40 = arith.constant 0 : index
    %c0_41 = arith.constant 0 : index
    %77 = vector.load %arg2[%c8, %c0_40, %c0_41] : memref<9x1x256xf32, #tpu.memory_space<vmem>>, vector<1x1x256xf32>
    %78 = vector.shape_cast %77 : vector<1x1x256xf32> to vector<1x256xf32>
    %79 = vector.broadcast %78 : vector<1x256xf32> to vector<4x256xf32>
    %80 = arith.mulf %76, %79 : vector<4x256xf32>
    %c8_42 = arith.constant 8 : index
    %c0_43 = arith.constant 0 : index
    %c0_44 = arith.constant 0 : index
    %81 = vector.load %arg3[%c8_42, %c0_43, %c0_44] : memref<9x4x1xf32, #tpu.memory_space<vmem>>, vector<1x4x1xf32>
    %82 = vector.shape_cast %81 : vector<1x4x1xf32> to vector<4x1xf32>
    %83 = vector.broadcast %82 : vector<4x1xf32> to vector<4x256xf32>
    %84 = arith.mulf %80, %83 : vector<4x256xf32>
    %85 = arith.addf %75, %84 : vector<4x256xf32>
    %c0_45 = arith.constant 0 : index
    %c0_46 = arith.constant 0 : index
    %86 = vector.load %arg4[%c0_45, %c0_46] : memref<4x1xf32, #tpu.memory_space<vmem>>, vector<4x1xf32>
    %87 = vector.broadcast %86 : vector<4x1xf32> to vector<4x256xf32>
    %88 = arith.addf %85, %87 : vector<4x256xf32>
    %cst = arith.constant 0.000000e+00 : f32
    %89 = vector.broadcast %cst : f32 to vector<4x256xf32>
    %90 = arith.maximumf %88, %89 : vector<4x256xf32>
    %c0_47 = arith.constant 0 : index
    %c0_48 = arith.constant 0 : index
    %91 = vector.load %arg5[%c0_47, %c0_48] : memref<8x4xf32, #tpu.memory_space<vmem>>, vector<8x4xf32>
    %cst_49 = arith.constant dense<0.000000e+00> : vector<8x256xf32>
    %92 = tpu.matmul %91, %90, %cst_49 {dimension_numbers = #tpu.dot_dimension_numbers<[1], [0], [0], [1], [0, 0, 1, 1], [], []>} : vector<8x4xf32>, vector<4x256xf32>, vector<8x256xf32> -> vector<8x256xf32>
    %c0_50 = arith.constant 0 : index
    %c0_51 = arith.constant 0 : index
    %93 = vector.load %arg6[%c0_50, %c0_51] : memref<8x1xf32, #tpu.memory_space<vmem>>, vector<8x1xf32>
    %94 = vector.broadcast %93 : vector<8x1xf32> to vector<8x256xf32>
    %95 = arith.addf %92, %94 : vector<8x256xf32>
    %cst_52 = arith.constant 0.000000e+00 : f32
    %96 = vector.broadcast %cst_52 : f32 to vector<8x256xf32>
    %97 = arith.maximumf %95, %96 : vector<8x256xf32>
    %c4_53 = arith.constant 4 : index
    %c0_54 = arith.constant 0 : index
    %c0_55 = arith.constant 0 : index
    %98 = vector.load %arg7[%c4_53, %c0_54, %c0_55] : memref<9x8x1xf32, #tpu.memory_space<vmem>>, vector<1x8x1xf32>
    %99 = vector.shape_cast %98 : vector<1x8x1xf32> to vector<8x1xf32>
    %100 = vector.broadcast %99 : vector<8x1xf32> to vector<8x256xf32>
    %101 = arith.mulf %97, %100 : vector<8x256xf32>
    %c17_i32_56 = arith.constant 17 : i32
    %102 = tpu.dynamic_rotate %97 by %c17_i32_56 dim 1 : vector<8x256xf32>, i32 -> vector<8x256xf32>
    %c0_57 = arith.constant 0 : index
    %c0_58 = arith.constant 0 : index
    %c0_59 = arith.constant 0 : index
    %103 = vector.load %arg2[%c0_57, %c0_58, %c0_59] : memref<9x1x256xf32, #tpu.memory_space<vmem>>, vector<1x1x256xf32>
    %104 = vector.shape_cast %103 : vector<1x1x256xf32> to vector<1x256xf32>
    %105 = vector.broadcast %104 : vector<1x256xf32> to vector<8x256xf32>
    %106 = arith.mulf %102, %105 : vector<8x256xf32>
    %c0_60 = arith.constant 0 : index
    %c0_61 = arith.constant 0 : index
    %c0_62 = arith.constant 0 : index
    %107 = vector.load %arg7[%c0_60, %c0_61, %c0_62] : memref<9x8x1xf32, #tpu.memory_space<vmem>>, vector<1x8x1xf32>
    %108 = vector.shape_cast %107 : vector<1x8x1xf32> to vector<8x1xf32>
    %109 = vector.broadcast %108 : vector<8x1xf32> to vector<8x256xf32>
    %110 = arith.mulf %106, %109 : vector<8x256xf32>
    %111 = arith.addf %101, %110 : vector<8x256xf32>
    %c16_i32_63 = arith.constant 16 : i32
    %112 = tpu.dynamic_rotate %97 by %c16_i32_63 dim 1 : vector<8x256xf32>, i32 -> vector<8x256xf32>
    %c1_64 = arith.constant 1 : index
    %c0_65 = arith.constant 0 : index
    %c0_66 = arith.constant 0 : index
    %113 = vector.load %arg2[%c1_64, %c0_65, %c0_66] : memref<9x1x256xf32, #tpu.memory_space<vmem>>, vector<1x1x256xf32>
    %114 = vector.shape_cast %113 : vector<1x1x256xf32> to vector<1x256xf32>
    %115 = vector.broadcast %114 : vector<1x256xf32> to vector<8x256xf32>
    %116 = arith.mulf %112, %115 : vector<8x256xf32>
    %c1_67 = arith.constant 1 : index
    %c0_68 = arith.constant 0 : index
    %c0_69 = arith.constant 0 : index
    %117 = vector.load %arg7[%c1_67, %c0_68, %c0_69] : memref<9x8x1xf32, #tpu.memory_space<vmem>>, vector<1x8x1xf32>
    %118 = vector.shape_cast %117 : vector<1x8x1xf32> to vector<8x1xf32>
    %119 = vector.broadcast %118 : vector<8x1xf32> to vector<8x256xf32>
    %120 = arith.mulf %116, %119 : vector<8x256xf32>
    %121 = arith.addf %111, %120 : vector<8x256xf32>
    %c15_i32_70 = arith.constant 15 : i32
    %122 = tpu.dynamic_rotate %97 by %c15_i32_70 dim 1 : vector<8x256xf32>, i32 -> vector<8x256xf32>
    %c2_71 = arith.constant 2 : index
    %c0_72 = arith.constant 0 : index
    %c0_73 = arith.constant 0 : index
    %123 = vector.load %arg2[%c2_71, %c0_72, %c0_73] : memref<9x1x256xf32, #tpu.memory_space<vmem>>, vector<1x1x256xf32>
    %124 = vector.shape_cast %123 : vector<1x1x256xf32> to vector<1x256xf32>
    %125 = vector.broadcast %124 : vector<1x256xf32> to vector<8x256xf32>
    %126 = arith.mulf %122, %125 : vector<8x256xf32>
    %c2_74 = arith.constant 2 : index
    %c0_75 = arith.constant 0 : index
    %c0_76 = arith.constant 0 : index
    %127 = vector.load %arg7[%c2_74, %c0_75, %c0_76] : memref<9x8x1xf32, #tpu.memory_space<vmem>>, vector<1x8x1xf32>
    %128 = vector.shape_cast %127 : vector<1x8x1xf32> to vector<8x1xf32>
    %129 = vector.broadcast %128 : vector<8x1xf32> to vector<8x256xf32>
    %130 = arith.mulf %126, %129 : vector<8x256xf32>
    %131 = arith.addf %121, %130 : vector<8x256xf32>
    %c1_i32_77 = arith.constant 1 : i32
    %132 = tpu.dynamic_rotate %97 by %c1_i32_77 dim 1 : vector<8x256xf32>, i32 -> vector<8x256xf32>
    %c3_78 = arith.constant 3 : index
    %c0_79 = arith.constant 0 : index
    %c0_80 = arith.constant 0 : index
    %133 = vector.load %arg2[%c3_78, %c0_79, %c0_80] : memref<9x1x256xf32, #tpu.memory_space<vmem>>, vector<1x1x256xf32>
    %134 = vector.shape_cast %133 : vector<1x1x256xf32> to vector<1x256xf32>
    %135 = vector.broadcast %134 : vector<1x256xf32> to vector<8x256xf32>
    %136 = arith.mulf %132, %135 : vector<8x256xf32>
    %c3_81 = arith.constant 3 : index
    %c0_82 = arith.constant 0 : index
    %c0_83 = arith.constant 0 : index
    %137 = vector.load %arg7[%c3_81, %c0_82, %c0_83] : memref<9x8x1xf32, #tpu.memory_space<vmem>>, vector<1x8x1xf32>
    %138 = vector.shape_cast %137 : vector<1x8x1xf32> to vector<8x1xf32>
    %139 = vector.broadcast %138 : vector<8x1xf32> to vector<8x256xf32>
    %140 = arith.mulf %136, %139 : vector<8x256xf32>
    %141 = arith.addf %131, %140 : vector<8x256xf32>
    %c255_i32_84 = arith.constant 255 : i32
    %142 = tpu.dynamic_rotate %97 by %c255_i32_84 dim 1 : vector<8x256xf32>, i32 -> vector<8x256xf32>
    %c5_85 = arith.constant 5 : index
    %c0_86 = arith.constant 0 : index
    %c0_87 = arith.constant 0 : index
    %143 = vector.load %arg2[%c5_85, %c0_86, %c0_87] : memref<9x1x256xf32, #tpu.memory_space<vmem>>, vector<1x1x256xf32>
    %144 = vector.shape_cast %143 : vector<1x1x256xf32> to vector<1x256xf32>
    %145 = vector.broadcast %144 : vector<1x256xf32> to vector<8x256xf32>
    %146 = arith.mulf %142, %145 : vector<8x256xf32>
    %c5_88 = arith.constant 5 : index
    %c0_89 = arith.constant 0 : index
    %c0_90 = arith.constant 0 : index
    %147 = vector.load %arg7[%c5_88, %c0_89, %c0_90] : memref<9x8x1xf32, #tpu.memory_space<vmem>>, vector<1x8x1xf32>
    %148 = vector.shape_cast %147 : vector<1x8x1xf32> to vector<8x1xf32>
    %149 = vector.broadcast %148 : vector<8x1xf32> to vector<8x256xf32>
    %150 = arith.mulf %146, %149 : vector<8x256xf32>
    %151 = arith.addf %141, %150 : vector<8x256xf32>
    %c241_i32_91 = arith.constant 241 : i32
    %152 = tpu.dynamic_rotate %97 by %c241_i32_91 dim 1 : vector<8x256xf32>, i32 -> vector<8x256xf32>
    %c6_92 = arith.constant 6 : index
    %c0_93 = arith.constant 0 : index
    %c0_94 = arith.constant 0 : index
    %153 = vector.load %arg2[%c6_92, %c0_93, %c0_94] : memref<9x1x256xf32, #tpu.memory_space<vmem>>, vector<1x1x256xf32>
    %154 = vector.shape_cast %153 : vector<1x1x256xf32> to vector<1x256xf32>
    %155 = vector.broadcast %154 : vector<1x256xf32> to vector<8x256xf32>
    %156 = arith.mulf %152, %155 : vector<8x256xf32>
    %c6_95 = arith.constant 6 : index
    %c0_96 = arith.constant 0 : index
    %c0_97 = arith.constant 0 : index
    %157 = vector.load %arg7[%c6_95, %c0_96, %c0_97] : memref<9x8x1xf32, #tpu.memory_space<vmem>>, vector<1x8x1xf32>
    %158 = vector.shape_cast %157 : vector<1x8x1xf32> to vector<8x1xf32>
    %159 = vector.broadcast %158 : vector<8x1xf32> to vector<8x256xf32>
    %160 = arith.mulf %156, %159 : vector<8x256xf32>
    %161 = arith.addf %151, %160 : vector<8x256xf32>
    %c240_i32_98 = arith.constant 240 : i32
    %162 = tpu.dynamic_rotate %97 by %c240_i32_98 dim 1 : vector<8x256xf32>, i32 -> vector<8x256xf32>
    %c7_99 = arith.constant 7 : index
    %c0_100 = arith.constant 0 : index
    %c0_101 = arith.constant 0 : index
    %163 = vector.load %arg2[%c7_99, %c0_100, %c0_101] : memref<9x1x256xf32, #tpu.memory_space<vmem>>, vector<1x1x256xf32>
    %164 = vector.shape_cast %163 : vector<1x1x256xf32> to vector<1x256xf32>
    %165 = vector.broadcast %164 : vector<1x256xf32> to vector<8x256xf32>
    %166 = arith.mulf %162, %165 : vector<8x256xf32>
    %c7_102 = arith.constant 7 : index
    %c0_103 = arith.constant 0 : index
    %c0_104 = arith.constant 0 : index
    %167 = vector.load %arg7[%c7_102, %c0_103, %c0_104] : memref<9x8x1xf32, #tpu.memory_space<vmem>>, vector<1x8x1xf32>
    %168 = vector.shape_cast %167 : vector<1x8x1xf32> to vector<8x1xf32>
    %169 = vector.broadcast %168 : vector<8x1xf32> to vector<8x256xf32>
    %170 = arith.mulf %166, %169 : vector<8x256xf32>
    %171 = arith.addf %161, %170 : vector<8x256xf32>
    %c239_i32_105 = arith.constant 239 : i32
    %172 = tpu.dynamic_rotate %97 by %c239_i32_105 dim 1 : vector<8x256xf32>, i32 -> vector<8x256xf32>
    %c8_106 = arith.constant 8 : index
    %c0_107 = arith.constant 0 : index
    %c0_108 = arith.constant 0 : index
    %173 = vector.load %arg2[%c8_106, %c0_107, %c0_108] : memref<9x1x256xf32, #tpu.memory_space<vmem>>, vector<1x1x256xf32>
    %174 = vector.shape_cast %173 : vector<1x1x256xf32> to vector<1x256xf32>
    %175 = vector.broadcast %174 : vector<1x256xf32> to vector<8x256xf32>
    %176 = arith.mulf %172, %175 : vector<8x256xf32>
    %c8_109 = arith.constant 8 : index
    %c0_110 = arith.constant 0 : index
    %c0_111 = arith.constant 0 : index
    %177 = vector.load %arg7[%c8_109, %c0_110, %c0_111] : memref<9x8x1xf32, #tpu.memory_space<vmem>>, vector<1x8x1xf32>
    %178 = vector.shape_cast %177 : vector<1x8x1xf32> to vector<8x1xf32>
    %179 = vector.broadcast %178 : vector<8x1xf32> to vector<8x256xf32>
    %180 = arith.mulf %176, %179 : vector<8x256xf32>
    %181 = arith.addf %171, %180 : vector<8x256xf32>
    %c0_112 = arith.constant 0 : index
    %c0_113 = arith.constant 0 : index
    %182 = vector.load %arg8[%c0_112, %c0_113] : memref<8x1xf32, #tpu.memory_space<vmem>>, vector<8x1xf32>
    %183 = vector.broadcast %182 : vector<8x1xf32> to vector<8x256xf32>
    %184 = arith.addf %181, %183 : vector<8x256xf32>
    %cst_114 = arith.constant 0.000000e+00 : f32
    %185 = vector.broadcast %cst_114 : f32 to vector<8x256xf32>
    %186 = arith.maximumf %184, %185 : vector<8x256xf32>
    %c0_115 = arith.constant 0 : index
    %c0_116 = arith.constant 0 : index
    %187 = vector.load %arg9[%c0_115, %c0_116] : memref<8x8xf32, #tpu.memory_space<vmem>>, vector<8x8xf32>
    %cst_117 = arith.constant dense<0.000000e+00> : vector<8x256xf32>
    %188 = tpu.matmul %187, %186, %cst_117 {dimension_numbers = #tpu.dot_dimension_numbers<[1], [0], [0], [1], [0, 0, 1, 1], [], []>} : vector<8x8xf32>, vector<8x256xf32>, vector<8x256xf32> -> vector<8x256xf32>
    %c0_118 = arith.constant 0 : index
    %c0_119 = arith.constant 0 : index
    %189 = vector.load %arg10[%c0_118, %c0_119] : memref<8x1xf32, #tpu.memory_space<vmem>>, vector<8x1xf32>
    %190 = vector.broadcast %189 : vector<8x1xf32> to vector<8x256xf32>
    %191 = arith.addf %188, %190 : vector<8x256xf32>
    %cst_120 = arith.constant 0.000000e+00 : f32
    %192 = vector.broadcast %cst_120 : f32 to vector<8x256xf32>
    %193 = arith.maximumf %191, %192 : vector<8x256xf32>
    %c0_121 = arith.constant 0 : index
    %c0_122 = arith.constant 0 : index
    %c0_123 = arith.constant 0 : index
    %194 = vector.load %arg11[%c0_121, %c0_122, %c0_123] : memref<1x8x256xf32, #tpu.memory_space<vmem>>, vector<1x8x256xf32>
    %195 = vector.shape_cast %194 : vector<1x8x256xf32> to vector<8x256xf32>
    %196 = vector.shape_cast %193 : vector<8x256xf32> to vector<1x8x256xf32>
    tpu.vector_store %arg11[%c0_121, %c0_122, %c0_123], %196 {strides = array<i32>} : memref<1x8x256xf32, #tpu.memory_space<vmem>>, vector<1x8x256xf32>,
    return
  }
  func.func @transform_0(%arg0: i32) -> (i32, i32, i32) {
    %c0_i32 = arith.constant 0 : i32
    %c0_i32_0 = arith.constant 0 : i32
    %c0_i32_1 = arith.constant 0 : i32
    return %arg0, %c0_i32, %c0_i32_0 : i32, i32, i32
  }
  func.func @transform_1(%arg0: i32) -> (i32, i32, i32) {
    %c0_i32 = arith.constant 0 : i32
    %c0_i32_0 = arith.constant 0 : i32
    %c0_i32_1 = arith.constant 0 : i32
    %c0_i32_2 = arith.constant 0 : i32
    return %c0_i32, %c0_i32_0, %c0_i32_1 : i32, i32, i32
  }
  func.func @transform_2(%arg0: i32) -> (i32, i32, i32) {
    %c0_i32 = arith.constant 0 : i32
    %c0_i32_0 = arith.constant 0 : i32
    %c0_i32_1 = arith.constant 0 : i32
    %c0_i32_2 = arith.constant 0 : i32
    return %c0_i32, %c0_i32_0, %c0_i32_1 : i32, i32, i32
  }
  func.func @transform_3(%arg0: i32) -> (i32, i32) {
    %c0_i32 = arith.constant 0 : i32
    %c0_i32_0 = arith.constant 0 : i32
    %c0_i32_1 = arith.constant 0 : i32
    return %c0_i32, %c0_i32_0 : i32, i32
  }
  func.func @transform_4(%arg0: i32) -> (i32, i32) {
    %c0_i32 = arith.constant 0 : i32
    %c0_i32_0 = arith.constant 0 : i32
    %c0_i32_1 = arith.constant 0 : i32
    return %c0_i32, %c0_i32_0 : i32, i32
  }
  func.func @transform_5(%arg0: i32) -> (i32, i32) {
    %c0_i32 = arith.constant 0 : i32
    %c0_i32_0 = arith.constant 0 : i32
    %c0_i32_1 = arith.constant 0 : i32
    return %c0_i32, %c0_i32_0 : i32, i32
  }
  func.func @transform_6(%arg0: i32) -> (i32, i32, i32) {
    %c0_i32 = arith.constant 0 : i32
    %c0_i32_0 = arith.constant 0 : i32
    %c0_i32_1 = arith.constant 0 : i32
    %c0_i32_2 = arith.constant 0 : i32
    return %c0_i32, %c0_i32_0, %c0_i32_1 : i32, i32, i32
  }
  func.func @transform_7(%arg0: i32) -> (i32, i32) {
    %c0_i32 = arith.constant 0 : i32
    %c0_i32_0 = arith.constant 0 : i32
    %c0_i32_1 = arith.constant 0 : i32
    return %c0_i32, %c0_i32_0 : i32, i32
  }
  func.func @transform_8(%arg0: i32) -> (i32, i32) {
    %c0_i32 = arith.constant 0 : i32
    %c0_i32_0 = arith.constant 0 : i32
    %c0_i32_1 = arith.constant 0 : i32
    return %c0_i32, %c0_i32_0 : i32, i32
  }
  func.func @transform_9(%arg0: i32) -> (i32, i32) {
    %c0_i32 = arith.constant 0 : i32
    %c0_i32_0 = arith.constant 0 : i32
    %c0_i32_1 = arith.constant 0 : i32
    return %c0_i32, %c0_i32_0 : i32, i32
  }
  func.func @transform_10(%arg0: i32) -> (i32, i32, i32) {
    %c0_i32 = arith.constant 0 : i32
    %c0_i32_0 = arith.constant 0 : i32
    %c0_i32_1 = arith.constant 0 : i32
    return %arg0, %c0_i32, %c0_i32_0 : i32, i32, i32
  }
}

</mosaic_0001>

<bundles_post_ra>
// kernel: tpu_custom_call.1
= control target key start
LH: loop header
LB: loop body
LE: loop exit
PB: predicated region body
PF: predicated region fallthrough
CT: control target
= control target key end

     0   :  { %15 = vsyncpa [#allocation3], 0  ;;  %s1732_s0 = inlined_call_operand.vmem [shape: f32[2,4,256], index: 0, kind: input, shape index: {}]   ;;  %s1733_s1 = inlined_call_operand.vmem [shape: f32[9,1,256], index: 1, kind: input, shape index: {}]   ;;  %s1734_s2 = inlined_call_operand.vmem [shape: f32[9,4,1], index: 2, kind: input, shape index: {}]   ;;  %s1735_s3 = inlined_call_operand.vmem [shape: f32[4,1], index: 3, kind: input, shape index: {}]   ;;  %s1736_s4 = inlined_call_operand.vmem [shape: f32[8,4], index: 4, kind: input, shape index: {}]   ;;  %s1737_s5 = inlined_call_operand.vmem [shape: f32[8,1], index: 5, kind: input, shape index: {}]   ;;  %s1738_s6 = inlined_call_operand.vmem [shape: f32[9,8,1], index: 6, kind: input, shape index: {}]   ;;  %s1739_s7 = inlined_call_operand.vmem [shape: f32[8,1], index: 7, kind: input, shape index: {}]   ;;  %s1740_s8 = inlined_call_operand.vmem [shape: f32[8,8], index: 8, kind: input, shape index: {}]   ;;  %s1741_s9 = inlined_call_operand.vmem [shape: f32[8,1], index: 9, kind: input, shape index: {}]   ;;  %s1742_s10 = inlined_call_operand.hbm [shape: f32[2,8,256], index: 10, kind: output, shape index: {}]  }
   0x1   :  { %17 = vsyncpa [#allocation3 + $0x1], 0  ;;  %s1259_s13 = smov 0   ;;  %s1261_s14 = smov 0  }
   0x2   :  { %s1263_s15 = smov 0   ;;  %s1265_s16 = smov 0  }
   0x3 LB: > { %s1280_s17 = sadd.s32 4294967295, %s1192_s16   ;;  %s1035_s18 = sadd.s32 4294967294, %s1192_s16   ;;  %s1192_s16 = sphi %s1265_s16, %s1769_s16   ;;  %s1188_s15 = sphi %s1263_s15, %s1768_s15   ;;  %s1184_s14 = sphi %s1261_s14, %s1767_s14   ;;  %s1180_s13 = sphi %s1259_s13, %s1766_s13  }
   0x4   : > { %s1284_s19 = sadd.s32 1, %s1192_s16   ;;  %s245_s20 = sadd.s32 1, %s1188_s15 }
   0x5   : > { %s242_s21 = ssub.s32 %s1192_s16, %s1284_s19  ;;  %p255_p0 = scmp.ne.s32.totalorder %s1188_s15, %s1184_s14 }
   0x6   : > { %p243_p1 = scmp.eq.s32.totalorder %s242_s21, 0  ;;  %p256_p2 = scmp.eq.s32.totalorder %s1280_s17, 1 }
   0x7   : > { %p261_p3 = scmp.ne.s32.totalorder %s1184_s14, %s1180_s13  ;;  %p262_p4 = scmp.eq.s32.totalorder %s1035_s18, 1 }
   0x8   : > { %s1295_s22 = scalar_select %p243_p1, %s1188_s15, %s245_s20  }
   0x9   : > { %p1297_p5 = por %p256_p2, %p255_p0  ;;  %p1301_p6 = por %p262_p4, %p261_p3 }
   0xa   : > { %p1038_p7 = scmp.ge.s32.totalorder %s1192_s16, 1  ;;  %p315_p8 = scmp.lt.s32.totalorder %s1192_s16, 3 }
   0xc   : > { %p316_p9 = pnand %p1038_p7, %p315_p8 }
   0xd   : > { %p353_p10 = scmp.lt.s32.totalorder (!%p316_p9), %s1280_s17, 1  ;;  %s1195_s20 = smov (!%p316_p9), 17  }
   0xe   : > { %319 = sbr.rel (%p316_p9) target bundleno = 693 (0x2b5), region = 60  ;;  %s1755_s26 = smov (!%p316_p9), 16  }
   0xf   : > { %s1751_s29 = smov (!%p316_p9), 15   ;;  %s1747_s12 = smov (!%p316_p9), 1  }
  0x10   : > { %s1743_s25 = smov (!%p316_p9), 127   ;;  %s1745_s30 = smov (!%p316_p9), 113  }
  0x11   : > { %s1749_s21 = smov (!%p316_p9), 112   ;;  %s350_s18 = sand.u32 (!%p316_p9), 1, %s1184_s14  }
  0x13   : > { %v394_v0 = vld [vmem:[%s1734_s2] sm:$0xf]  ;;  %v1194_v1 = vmov 0   ;;  %s354_s27 = scalar_select %p353_p10, %s1280_s17, 1  ;;  %v1042_v3 = vld [vmem:[%s1734_s2 + $0x10] sm:$0xf]  ;;  %v381_v47 = vlaneseq }
  0x14   : > { %1127 = vset.pattern.permute.xlu2 %v1194_v1  ;;  %1128 = vset.pattern.permute.xlu0 %v1194_v1  ;;  %v1044_v6 = vld [vmem:[%s1734_s2 + $0x4] sm:$0xf]  ;;  %v1046_v9 = vld [vmem:[%s1734_s2 + $0x8] sm:$0xf]  ;;  %v1048_v12 = vld [vmem:[%s1734_s2 + $0xc] sm:$0xf] }
  0x15   : > { %397 = vperm.xlu2 %1127, %v394_v0   ;;  %1129 = vset.pattern.permute.xlu1 %v1194_v1  ;;  %s1076_s28 = sshll.u32 %s354_s27, 3  ;;  %v1050_v15 = vld [vmem:[%s1734_s2 + $0x14] sm:$0xf]  ;;  %v1052_v18 = vld [vmem:[%s1734_s2 + $0x18] sm:$0xf]  ;;  %v674_v24 = vld [vmem:[%s1737_s5] sm:$0xff] }
  0x16   : > { %s357_s11 = scalar_lea.vmem %s1732_s0, %s1076_s28  ;;  %v1054_v21 = vld [vmem:[%s1734_s2 + $0x1c] sm:$0xf]  ;;  %v1061_v26 = vld [vmem:[%s1738_s6 + $0x20] sm:$0xff]  ;;  %v1062_v31 = vld [vmem:[%s1738_s6 + $0x8] sm:$0xff]  ;;  %v1403_v50 = vand.u32 127, %v381_v47  ;;  %vm405_vm6 = vcmask 1043456  }
  0x17   : > { %v1315_v2 = vld [vmem:[%s357_s11] sm:$0xff]  ;;  %s1753_s11 = smov 111   ;;  %v1063_v32 = vld [vmem:[%s1738_s6 + $0x10] sm:$0xff]  ;;  %v1064_v33 = vld [vmem:[%s1738_s6 + $0x18] sm:$0xff]  ;;  %v1203_v61 = vmov 839922192  }
  0x18   : > { %372 = vst [vmem:[#allocation1] ss:$2 sm:$0xff] %v1315_v2  ;;  %v1056_v28 = vld [vmem:[%s1734_s2 + $0x20] sm:$0xf]  ;;  %v1065_v34 = vld [vmem:[%s1738_s6 + $0x28] sm:$0xff]  ;;  %vm383_vm0 = vcmp.lt.s32.totalorder %v1403_v50, 17  ;;  %v1433_v62 = vunpack.c.l.s4 %v1203_v61 }
  0x19   : > { %v661_v29 = vld [vmem:[%s1735_s3] sm:$0xf]  ;;  %vm418_vm1 = vcmp.lt.s32.totalorder %v1403_v50, 16  ;;  %v1426_v57 = vld [vmem:[%s1733_s1 + $0x4] sm:$0x3]  ;;  %vm454_vm2 = vcmp.lt.s32.totalorder %v1403_v50, 15 }
  0x1a   : > { %v751_v30 = vld [vmem:[%s1738_s6] sm:$0xff]  ;;  %v461_v0 = vperm.slane %v1426_v57, 1  ;;  %vm490_vm3 = vcmp.lt.s32.totalorder %v1403_v50, 1  ;;  %vm526_vm4 = vcmp.lt.s32.totalorder %v1403_v50, 127  ;;  %vm562_vm5 = vcmp.lt.s32.totalorder %v1403_v50, 113  ;;  %s1759_s27 = smov 16  }
  0x1b   : > { %v1408_v51 = vld [vmem:[%s1733_s1] sm:$0x3]  ;;  %v1414_v52 = vld [vmem:[%s1733_s1 + $0x2] sm:$0x3]  ;;  %v1441_v1 = vld [vmem:[%s1733_s1 + $0x6] sm:$0x3] }
  0x1c   : > { %v389_v54 = vperm.slane %v1408_v51, 1  ;;  %v425_v56 = vperm.slane %v1414_v52, 1  ;;  %vm598_vm7 = vcmp.lt.s32.totalorder %v1403_v50, 112  ;;  %vm634_vm8 = vcmp.lt.s32.totalorder %v1403_v50, 111 }
  0x1d   : > { %363 = vperm.xlu2 %1127, %v1042_v3   ;;  %vm684_vm9 = vcmask 31744   ;;  %vm911_vm10 = vcmask 64512  }
  0x1f   : > { %v373_v4 = vld.sshfl [vmem:[#allocation1] sm:$0xff pattern:$0x75316420]  ;;  %v374_v5 = vld.sshfl [vmem:[#allocation1 + $0x8] sm:$0xff pattern:$0x75316420] }
  0x20   : > { %377 = vrot.lane.b32.xlu0 %v373_v4, %s1195_s20  ;;  %409 = vst [vmem:[#allocation1] ss:$2 sm:$0xff] %v1315_v2 }
  0x25   : > { %434 = vperm.xlu2 %1127, %v1044_v6   ;;  %v424_v6 = vperm.slane %v1414_v52, 0 }
  0x27   : > { %v410_v7 = vld.sshfl [vmem:[#allocation1] sm:$0xff pattern:$0x75316420]  ;;  %v411_v8 = vld.sshfl [vmem:[#allocation1 + $0x8] sm:$0xff pattern:$0x75316420] }
  0x28   : > { %379 = vrot.lane.b32.xlu0 %v374_v5, %s1195_s20  ;;  %414 = vrot.lane.b32.xlu1 %v410_v7, %s1755_s26  ;;  %445 = vst [vmem:[#allocation1] ss:$2 sm:$0xff] %v1315_v2  ;;  %v388_v5 = vperm.slane %v1408_v51, 0  ;;  %v1453_v7 = vld [vmem:[%s1733_s1 + $0xa] sm:$0x3] }
  0x2d   : > { %470 = vperm.xlu2 %1127, %v1046_v9  }
  0x2f   : > { %v446_v10 = vld.sshfl [vmem:[#allocation1] sm:$0xff pattern:$0x75316420]  ;;  %v447_v11 = vld.sshfl [vmem:[#allocation1 + $0x8] sm:$0xff pattern:$0x75316420] }
  0x30   : > { %416 = vrot.lane.b32.xlu1 %v411_v8, %s1755_s26  ;;  %450 = vrot.lane.b32.xlu0 %v446_v10, %s1751_s29  ;;  %481 = vst [vmem:[#allocation1] ss:$2 sm:$0xff] %v1315_v2  ;;  %v497_v10 = vperm.slane %v1441_v1, 1 }
  0x35   : > { %506 = vperm.xlu2 %1127, %v1048_v12  }
  0x37   : > { %v482_v13 = vld.sshfl [vmem:[#allocation1] sm:$0xff pattern:$0x75316420]  ;;  %v483_v14 = vld.sshfl [vmem:[#allocation1 + $0x8] sm:$0xff pattern:$0x75316420] }
  0x38   : > { %452 = vrot.lane.b32.xlu1 %v447_v11, %s1751_s29  ;;  %486 = vrot.lane.b32.xlu0 %v482_v13, %s1747_s12  ;;  %517 = vst [vmem:[#allocation1] ss:$2 sm:$0xff] %v1315_v2  ;;  %v367_v11 = vunpack.c.0.s8 %v1433_v62  ;;  %s1765_s29 = smov 111  }
  0x3d   : > { %542 = vperm.xlu2 %1127, %v1050_v15   ;;  %v1472_v15 = vld [vmem:[%s1733_s1 + $0xc] sm:$0x3] }
  0x3f   : > { %v518_v16 = vld.sshfl [vmem:[#allocation1] sm:$0xff pattern:$0x75316420]  ;;  %v519_v17 = vld.sshfl [vmem:[#allocation1 + $0x8] sm:$0xff pattern:$0x75316420] }
  0x40   : > { %488 = vrot.lane.b32.xlu1 %v483_v14, %s1747_s12  ;;  %522 = vrot.lane.b32.xlu0 %v518_v16, %s1743_s25  ;;  %553 = vst [vmem:[#allocation1] ss:$2 sm:$0xff] %v1315_v2  ;;  %s1762_s12 = smov 127  }
  0x45   : > { %578 = vperm.xlu2 %1127, %v1052_v18  }
  0x47   : > { %v554_v19 = vld.sshfl [vmem:[#allocation1] sm:$0xff pattern:$0x75316420]  ;;  %v555_v20 = vld.sshfl [vmem:[#allocation1 + $0x8] sm:$0xff pattern:$0x75316420] }
  0x48   : > { %524 = vrot.lane.b32.xlu1 %v519_v17, %s1743_s25  ;;  %558 = vrot.lane.b32.xlu0 %v554_v19, %s1745_s30  ;;  %589 = vst [vmem:[#allocation1] ss:$2 sm:$0xff] %v1315_v2  ;;  %v533_v17 = vperm.slane %v1453_v7, 1  ;;  %s1761_s25 = smov 1  }
  0x4d   : > { %614 = vperm.xlu2 %1127, %v1054_v21  }
  0x4f   : > { %v590_v22 = vld.sshfl [vmem:[#allocation1] sm:$0xff pattern:$0x75316420]  ;;  %v591_v23 = vld.sshfl [vmem:[#allocation1 + $0x8] sm:$0xff pattern:$0x75316420] }
  0x50   : > { %560 = vrot.lane.b32.xlu1 %v555_v20, %s1745_s30  ;;  %594 = vrot.lane.b32.xlu0 %v590_v22, %s1749_s21  ;;  %625 = vst [vmem:[#allocation1] ss:$2 sm:$0xff] %v1315_v2  ;;  %s1763_s30 = smov 113  }
  0x55   : > { %677 = vperm.xlu2 %1127, %v674_v24  }
  0x57   : > { %v626_v25 = vld.sshfl [vmem:[#allocation1] sm:$0xff pattern:$0x75316420]  ;;  %v627_v27 = vld.sshfl [vmem:[#allocation1 + $0x8] sm:$0xff pattern:$0x75316420] }
  0x58   : > { %596 = vrot.lane.b32.xlu1 %v591_v23, %s1749_s21  ;;  %630 = vrot.lane.b32.xlu0 %v626_v25, %s1753_s11  ;;  %v460_v23 = vperm.slane %v1426_v57, 0  ;;  %s1760_s21 = smov 15  }
  0x5d   : > { %738 = vperm.xlu2 %1127, %v1061_v26  }
  0x60   : > { %632 = vrot.lane.b32.xlu1 %v627_v27, %s1753_s11  ;;  %650 = vperm.xlu0 %1128, %v1056_v28   ;;  %v569_v27 = vperm.slane %v1472_v15, 1 }
  0x68   : > { %664 = vperm.xlu1 %1129, %v661_v29   ;;  %754 = vperm.xlu0 %1128, %v751_v30  }
  0x6f   : > { %v1389_v35 = vpop.permute.xlu2 %397 }
  0x70   : > { %773 = vperm.xlu0 %1128, %v1062_v31  }
  0x77   : > { %v364_v36 = vpop.permute.xlu2 %363 }
  0x78   : > { %792 = vperm.xlu0 %1128, %v1063_v32   ;;  %v368_v28 = vperm.slane %v364_v36, %v367_v11  ;;  %v1501_v32 = vld [vmem:[%s1733_s1 + $0xe] sm:$0x3] }
  0x7f   : > { %v1391_v40 = vpop.permute.xlu2 %434 }
  0x80   : > { %811 = vperm.xlu0 %1128, %v1064_v33  }
  0x87   : > { %v1393_v43 = vpop.permute.xlu2 %470 }
  0x88   : > { %830 = vperm.xlu0 %1128, %v1065_v34   ;;  %v496_v34 = vperm.slane %v1441_v1, 0 }
  0x8f   : > { %v1397_v46 = vpop.permute.xlu2 %506 }
  0x92   : > { %v378_v37 = vpop.permute.xlu0 %377 }
  0x97   : > { %v1417_v53 = vpop.permute.xlu2 %542 }
  0x9a   : > { %v380_v38 = vpop.permute.xlu0 %379  ;;  %v415_v39 = vpop.permute.xlu1 %414 }
  0x9b   : > { %v384_v55 = vsel %vm383_vm0, %v378_v37, %v380_v38  ;;  %v385_v8 = vsel %vm383_vm0, %v380_v38, %v378_v37  ;;  %v532_v37 = vperm.slane %v1453_v7, 0 }
  0x9c   : > { %v393_v63 = vmul.f32 %v389_v54, %v384_v55  ;;  %v392_v20 = vmul.f32 %v388_v5, %v385_v8  ;;  %v605_v55 = vperm.slane %v1501_v32, 1 }
  0x9e   : > { %v401_v12 = vmul.f32 %v1389_v35, %v393_v63  ;;  %v400_v38 = vmul.f32 %v1389_v35, %v392_v20  ;;  %v370_v35 = vmul.f32 %v368_v28, %v1315_v2 }
  0x9f   : > { %v1479_v21 = vpop.permute.xlu2 %578 }
  0xa0   : > { %v404_v29 = vrot.slane %v401_v12, 4 }
  0xa2   : > { %v417_v41 = vpop.permute.xlu1 %416  ;;  %v451_v42 = vpop.permute.xlu0 %450 }
  0xa3   : > { %v419_v60 = vsel %vm418_vm1, %v415_v39, %v417_v41  ;;  %v420_v9 = vsel %vm418_vm1, %v417_v41, %v415_v39 }
  0xa4   : > { %v429_v3 = vmul.f32 %v425_v56, %v419_v60  ;;  %v428_v22 = vmul.f32 %v424_v6, %v420_v9  ;;  %v604_v9 = vperm.slane %v1501_v32, 0 }
  0xa6   : > { %v438_v16 = vmul.f32 %v1391_v40, %v429_v3  ;;  %v437_v39 = vmul.f32 %v1391_v40, %v428_v22  ;;  %v406_v40 = vsel %vm405_vm6, %v400_v38, %v404_v29  ;;  %v568_v3 = vperm.slane %v1472_v15, 0 }
  0xa8   : > { %v441_v33 = vrot.slane %v438_v16, 4 }
  0xaa   : > { %v453_v44 = vpop.permute.xlu1 %452  ;;  %v1395_v45 = vpop.permute.xlu0 %486 }
  0xab   : > { %v455_v4 = vsel %vm454_vm2, %v451_v42, %v453_v44  ;;  %v456_v25 = vsel %vm454_vm2, %v453_v44, %v451_v42 }
  0xac   : > { %v465_v13 = vmul.f32 %v461_v0, %v455_v4  ;;  %v464_v41 = vmul.f32 %v460_v23, %v456_v25 }
  0xae   : > { %v474_v30 = vmul.f32 %v1393_v43, %v465_v13  ;;  %v473_v8 = vmul.f32 %v1393_v43, %v464_v41  ;;  %v1545_v43 = vld [vmem:[%s1733_s1 + $0x10] sm:$0x3] }
  0xb0   : > { %v477_v60 = vrot.slane %v474_v30, 4  ;;  %v640_v30 = vperm.slane %v1545_v43, 0 }
  0xb2   : > { %v1399_v48 = vpop.permute.xlu1 %488  ;;  %v1401_v49 = vpop.permute.xlu0 %522  ;;  %v478_v20 = vsel %vm405_vm6, %v473_v8, %v477_v60 }
  0xb3   : > { %v491_v14 = vsel %vm490_vm3, %v1395_v45, %v1399_v48  ;;  %v492_v42 = vsel %vm490_vm3, %v1399_v48, %v1395_v45  ;;  %v442_v45 = vsel %vm405_vm6, %v437_v39, %v441_v33 }
  0xb4   : > { %v501_v26 = vmul.f32 %v497_v10, %v491_v14  ;;  %v500_v48 = vmul.f32 %v496_v34, %v492_v42 }
  0xb6   : > { %v510_v44 = vmul.f32 %v1397_v46, %v501_v26 }
  0xb8   : > { %v513_v12 = vrot.slane %v510_v44, 4 }
  0xba   : > { %v525_v58 = vpop.permute.xlu1 %524  ;;  %v1428_v59 = vpop.permute.xlu0 %558 }
  0xbb   : > { %v528_v24 = vsel %vm526_vm4, %v525_v58, %v1401_v49  ;;  %v527_v61 = vsel %vm526_vm4, %v1401_v49, %v525_v58 }
  0xbc   : > { %v537_v36 = vmul.f32 %v533_v17, %v528_v24  ;;  %v536_v13 = vmul.f32 %v532_v37, %v527_v61  ;;  %v509_v24 = vmul.f32 %v1397_v46, %v500_v48 }
  0xbe   : > { %v546_v63 = vmul.f32 %v1417_v53, %v537_v36  ;;  %v514_v33 = vsel %vm405_vm6, %v509_v24, %v513_v12  ;;  %v545_v36 = vmul.f32 %v1417_v53, %v536_v13 }
  0xc0   : > { %v549_v25 = vrot.slane %v546_v63, 4 }
  0xc2   : > { %v561_v18 = vpop.permute.xlu1 %560  ;;  %v595_v19 = vpop.permute.xlu0 %594  ;;  %v550_v39 = vsel %vm405_vm6, %v545_v36, %v549_v25  ;;  %v1066_v36 = vld [vmem:[%s1738_s6 + $0x30] sm:$0xff] }
  0xc3   : > { %v564_v31 = vsel %vm562_vm5, %v561_v18, %v1428_v59  ;;  %v563_v2 = vsel %vm562_vm5, %v1428_v59, %v561_v18  ;;  %v408_v59 = vadd.f32 %v406_v40, %v370_v35  ;;  %v615_v18 = vpop.permute.xlu2 %614 }
  0xc4   : > { %v573_v47 = vmul.f32 %v569_v27, %v564_v31  ;;  %v572_v26 = vmul.f32 %v568_v3, %v563_v2  ;;  %v641_v31 = vperm.slane %v1545_v43, 1  ;;  %v904_v43 = vld [vmem:[%s1740_s8] sm:$0xff] }
  0xc5   : > { %v444_v29 = vadd.f32 %v442_v45, %v408_v59 }
  0xc6   : > { %v582_v14 = vmul.f32 %v1479_v21, %v573_v47  ;;  %v581_v41 = vmul.f32 %v1479_v21, %v572_v26 }
  0xc8   : > { %v585_v38 = vrot.slane %v582_v14, 4 }
  0xca   : > { %v597_v4 = vpop.permute.xlu1 %596  ;;  %v631_v58 = vpop.permute.xlu0 %630  ;;  %v586_v53 = vsel %vm405_vm6, %v581_v41, %v585_v38  ;;  %v1067_v38 = vld [vmem:[%s1738_s6 + $0x38] sm:$0xff] }
  0xcb   : > { %v600_v49 = vsel %vm598_vm7, %v597_v4, %v595_v19  ;;  %v599_v22 = vsel %vm598_vm7, %v595_v19, %v597_v4  ;;  %v480_v19 = vadd.f32 %v478_v20, %v444_v29  ;;  %v673_v20 = vld [vmem:[%s1736_s4] sm:$0xff]  ;;  %v678_v25 = vpop.permute.xlu2 %677 }
  0xcc   : > { %v609_v16 = vmul.f32 %v605_v55, %v600_v49  ;;  %v608_v46 = vmul.f32 %v604_v9, %v599_v22 }
  0xcd   : > { %v516_v47 = vadd.f32 %v514_v33, %v480_v19  ;;  %v894_v19 = vld [vmem:[%s1739_s7] sm:$0xff] }
  0xce   : > { %v618_v28 = vmul.f32 %v615_v18, %v609_v16  ;;  %v617_v60 = vmul.f32 %v615_v18, %v608_v46  ;;  %v905_v46 = vld [vmem:[%s1741_s9] sm:$0xff] }
  0xcf   : > { %v552_v48 = vadd.f32 %v550_v39, %v516_v47  ;;  %v1068_v39 = vld [vmem:[%s1738_s6 + $0x40] sm:$0xff] }
  0xd0   : > { %v621_v42 = vrot.slane %v618_v28, 4 }
  0xd1   : > { %v588_v8 = vadd.f32 %v586_v53, %v552_v48 }
  0xd2   : > { %v633_v44 = vpop.permute.xlu1 %632  ;;  %v651_v21 = vpop.permute.xlu0 %650  ;;  %v622_v4 = vsel %vm405_vm6, %v617_v60, %v621_v42 }
  0xd3   : > { %v635_v35 = vsel %vm634_vm8, %v631_v58, %v633_v44  ;;  %v636_v40 = vsel %vm634_vm8, %v633_v44, %v631_v58  ;;  %v624_v12 = vadd.f32 %v622_v4, %v588_v8  ;;  %v739_v41 = vpop.permute.xlu2 %738 }
  0xd4   : > { %v644_v61 = vmul.f32 %v640_v30, %v635_v35  ;;  %v645_v45 = vmul.f32 %v641_v31, %v636_v40 }
  0xd6   : > { %v654_v63 = vmul.f32 %v651_v21, %v645_v45  ;;  %v653_v2 = vmul.f32 %v651_v21, %v644_v61 }
  0xd8   : > { %v657_v49 = vrot.slane %v654_v63, 4 }
  0xda   : > { %v665_v13 = vpop.permute.xlu1 %664  ;;  %v658_v58 = vsel %vm405_vm6, %v653_v2, %v657_v49  ;;  %v755_v42 = vpop.permute.xlu0 %754 }
  0xdb   : > { %v660_v14 = vadd.f32 %v658_v58, %v624_v12  ;;  %v669_v16 = vperm.slane %v665_v13, %v367_v11 }
  0xdd   : > { %v671_v59 = vadd.f32 %v669_v16, %v660_v14 }
  0xdf   : > { %v672_v18 = vmax.f32 %v671_v59, 0.0 }
  0xe1   : > { %681 = vst [vmem:[#allocation1] ss:$2 sm:$0xff] %v672_v18 }
  0xe2   : > { %v774_v35 = vpop.permute.xlu0 %773 }
  0xe8   : > { %v682_v22 = vld.sshfl [vmem:[#allocation1] sm:$0xff pattern:$0x75316420]  ;;  %v683_v24 = vld.sshfl [vmem:[#allocation1 + $0x8] sm:$0xff pattern:$0x75316420] }
  0xe9   : > { %1057 = vmatpush.msk.msra.mxu0 %vm405_vm6, %v682_v22  ;;  %1059 = vmatpush.msk.msra.mxu1 %vm405_vm6, %v683_v24 }
  0xea   : > { %1058 = vmatmul.msk.f32.vlgmr.msra.gmra.mxu0 %vm684_vm9, %v673_v20  ;;  %1060 = vmatmul.msk.f32.vlgmr.msra.gmra.mxu1 %vm684_vm9, %v673_v20  ;;  %v793_v60 = vpop.permute.xlu0 %792 }
  0xf2   : > { %v812_v48 = vpop.permute.xlu0 %811 }
  0xfa   : > { %v831_v4 = vpop.permute.xlu0 %830 }
 0x167   : > { %v709_v26 = vpop.f32.mrf.mxu0  ;;  %v729_v62 = vpop.f32.mrf.mxu1 }
 0x168   : > { %v710_v11 = vadd.f32 %v709_v26, %v678_v25  ;;  %v730_v28 = vadd.f32 %v729_v62, %v678_v25 }
 0x16a   : > { %v1580_v29 = vmax.f32 %v710_v11, 0.0  ;;  %v1582_v33 = vmax.f32 %v730_v28, 0.0 }
 0x16c   : > { %745 = vrot.lane.b32.xlu2 %v1582_v33, %s1195_s20  ;;  %761 = vrot.lane.b32.xlu0 %v1580_v29, %s1759_s27  ;;  %v741_v52 = vmul.f32 %v739_v41, %v1580_v29 }
 0x16d   : > { %743 = vrot.lane.b32.xlu1 %v1580_v29, %s1195_s20 }
 0x174   : > { %782 = vrot.lane.b32.xlu2 %v1582_v33, %s1760_s21  ;;  %849 = vperm.xlu0 %1128, %v1066_v36  }
 0x175   : > { %763 = vrot.lane.b32.xlu1 %v1582_v33, %s1759_s27  ;;  %s1764_s27 = smov 112  }
 0x17c   : > { %801 = vrot.lane.b32.xlu2 %v1582_v33, %s1761_s25  ;;  %868 = vperm.xlu0 %1128, %v1067_v38  }
 0x17d   : > { %780 = vrot.lane.b32.xlu1 %v1580_v29, %s1760_s21 }
 0x184   : > { %820 = vrot.lane.b32.xlu2 %v1582_v33, %s1762_s12  ;;  %908 = vperm.xlu0 %1128, %v905_v46  }
 0x185   : > { %799 = vrot.lane.b32.xlu1 %v1580_v29, %s1761_s25 }
 0x18c   : > { %839 = vrot.lane.b32.xlu2 %v1582_v33, %s1763_s30 }
 0x18d   : > { %818 = vrot.lane.b32.xlu1 %v1580_v29, %s1762_s12  ;;  %s1039_s12 = sshll.u32 %s350_s18, 4 }
 0x18e   : > { %s352_s21 = scalar_lea.vmem [#allocation2], %s1039_s12  ;;  %s1150_s12 = scalar_lea.hbm %s1742_s10, 32 }
 0x18f   : > { %s973_s11 = sshll.u32 %s352_s21, 4  ;;  %s974_s11 = int_to_ptr.vmem [resolvable:$true] %s973_s11 }
 0x194   : > { %858 = vrot.lane.b32.xlu2 %v1582_v33, %s1764_s27 }
 0x195   : > { %837 = vrot.lane.b32.xlu1 %v1580_v29, %s1763_s30  ;;  %s1077_s30 = sshll.u32 %s1280_s17, 4  ;;  %s960_s17 = scalar_lea.sflag [#allocation3], %s350_s18 }
 0x196   : > { %s971_s26 = scalar_lea.hbm %s1742_s10, %s1077_s30 }
 0x197   : > { %s975_s28 = sshll.u32 %s971_s26, 4  ;;  %s976_s28 = int_to_ptr.hbm [resolvable:$true] %s975_s28 }
 0x198   : > { %s1144_s25 = sshra.s32 %s976_s28, 4  ;;  %s1145_s25 = int_to_ptr.hbm [resolvable:$true] %s1144_s25 }
 0x199   : > { %s1146_s20 = scalar_lea.hbm %s1145_s25, 16  ;;  %p1151_p0 = scmp.lt.s32.totalorder %s1145_s25, %s1742_s10 }
 0x19a   : > { %p1147_p11 = scmp.ne.s32.totalorder %s1145_s25, %s1146_s20  ;;  %p1152_p1 = scmp.lt.s32.totalorder %s1150_s12, %s1146_s20 }
 0x19c   : > { %877 = vrot.lane.b32.xlu2 %v1582_v33, %s1765_s29  ;;  %p1148_p12 = pnand %p1147_p11, %p1297_p5  ;;  %p1153_p2 = por %p1152_p1, %p1151_p0 }
 0x19d   : > { %856 = vrot.lane.b32.xlu1 %v1580_v29, %s1764_s27 }
 0x19e   : > { %p1149_p13 = pneg %p1148_p12 }
 0x1a0   : > { %p1154_p3 = pnand %p1153_p2, %p1149_p13 }
 0x1a4   : > { %897 = vperm.xlu2 %1127, %v894_v19  }
 0x1a5   : > { %875 = vrot.lane.b32.xlu1 %v1580_v29, %s1765_s29 }
 0x1ad   : > { %887 = vperm.xlu1 %1129, %v1068_v39  }
 0x1c6   : > { %v746_v44 = vpop.permute.xlu2 %745 }
 0x1ce   : > { %v783_v40 = vpop.permute.xlu2 %782 }
 0x1d6   : > { %v802_v45 = vpop.permute.xlu2 %801 }
 0x1de   : > { %v821_v63 = vpop.permute.xlu2 %820  ;;  %v762_v49 = vpop.permute.xlu0 %761 }
 0x1df   : > { %v744_v47 = vpop.permute.xlu1 %743 }
 0x1e0   : > { %v747_v12 = vsel %vm383_vm0, %v744_v47, %v746_v44  ;;  %v748_v13 = vsel %vm383_vm0, %v746_v44, %v744_v47 }
 0x1e1   : > { %v749_v14 = vmul.f32 %v748_v13, %v388_v5  ;;  %v750_v16 = vmul.f32 %v747_v12, %v389_v54 }
 0x1e3   : > { %v757_v51 = vmul.f32 %v755_v42, %v749_v14  ;;  %v758_v54 = vmul.f32 %v755_v42, %v750_v16 }
 0x1e6   : > { %v840_v2 = vpop.permute.xlu2 %839 }
 0x1e7   : > { %v764_v53 = vpop.permute.xlu1 %763 }
 0x1e8   : > { %v765_v59 = vsel %vm418_vm1, %v762_v49, %v764_v53  ;;  %v766_v18 = vsel %vm418_vm1, %v764_v53, %v762_v49 }
 0x1e9   : > { %v767_v24 = vmul.f32 %v766_v18, %v424_v6  ;;  %v768_v5 = vmul.f32 %v765_v59, %v425_v56  ;;  %v742_v6 = vmul.f32 %v739_v41, %v1582_v33  ;;  %v850_v56 = vpop.permute.xlu0 %849 }
 0x1eb   : > { %v776_v38 = vmul.f32 %v774_v35, %v767_v24  ;;  %v777_v46 = vmul.f32 %v774_v35, %v768_v5  ;;  %v760_v19 = vadd.f32 %v758_v54, %v742_v6 }
 0x1ed   : > { %v779_v53 = vadd.f32 %v777_v46, %v760_v19 }
 0x1ee   : > { %v859_v25 = vpop.permute.xlu2 %858 }
 0x1ef   : > { %v781_v61 = vpop.permute.xlu1 %780 }
 0x1f0   : > { %v784_v20 = vsel %vm454_vm2, %v781_v61, %v783_v40  ;;  %v785_v22 = vsel %vm454_vm2, %v783_v40, %v781_v61 }
 0x1f1   : > { %v786_v26 = vmul.f32 %v785_v22, %v460_v23  ;;  %v787_v62 = vmul.f32 %v784_v20, %v461_v0  ;;  %v759_v0 = vadd.f32 %v757_v51, %v741_v52 }
 0x1f3   : > { %v795_v33 = vmul.f32 %v793_v60, %v786_v26  ;;  %v796_v44 = vmul.f32 %v793_v60, %v787_v62  ;;  %v778_v40 = vadd.f32 %v776_v38, %v759_v0 }
 0x1f6   : > { %v878_v49 = vpop.permute.xlu2 %877 }
 0x1f7   : > { %v800_v21 = vpop.permute.xlu1 %799 }
 0x1f8   : > { %v803_v11 = vsel %vm490_vm3, %v800_v21, %v802_v45  ;;  %v804_v28 = vsel %vm490_vm3, %v802_v45, %v800_v21  ;;  %v798_v21 = vadd.f32 %v796_v44, %v779_v53 }
 0x1f9   : > { %v805_v39 = vmul.f32 %v804_v28, %v496_v34  ;;  %v806_v42 = vmul.f32 %v803_v11, %v497_v10 }
 0x1fb   : > { %v814_v34 = vmul.f32 %v812_v48, %v805_v39  ;;  %v815_v60 = vmul.f32 %v812_v48, %v806_v42 }
 0x1fd   : > { %v817_v48 = vadd.f32 %v815_v60, %v798_v21 }
 0x1ff   : > { %v819_v8 = vpop.permute.xlu1 %818 }
 0x200   : > { %v822_v23 = vsel %vm526_vm4, %v819_v8, %v821_v63  ;;  %v823_v57 = vsel %vm526_vm4, %v821_v63, %v819_v8 }
 0x201   : > { %v824_v47 = vmul.f32 %v822_v23, %v532_v37  ;;  %v825_v35 = vmul.f32 %v823_v57, %v533_v17  ;;  %v797_v37 = vadd.f32 %v795_v33, %v778_v40 }
 0x203   : > { %v833_v17 = vmul.f32 %v831_v4, %v824_v47  ;;  %v834_v63 = vmul.f32 %v831_v4, %v825_v35  ;;  %v816_v12 = vadd.f32 %v814_v34, %v797_v37 }
 0x205   : > { %v835_v14 = vadd.f32 %v833_v17, %v816_v12  ;;  %v836_v4 = vadd.f32 %v834_v63, %v817_v48 }
 0x207   : > { %v838_v58 = vpop.permute.xlu1 %837 }
 0x208   : > { %v841_v29 = vsel %vm562_vm5, %v838_v58, %v840_v2  ;;  %v842_v41 = vsel %vm562_vm5, %v840_v2, %v838_v58 }
 0x209   : > { %v843_v61 = vmul.f32 %v841_v29, %v568_v3  ;;  %v844_v45 = vmul.f32 %v842_v41, %v569_v27  ;;  %v869_v3 = vpop.permute.xlu0 %868 }
 0x20b   : > { %v852_v13 = vmul.f32 %v850_v56, %v843_v61  ;;  %v853_v58 = vmul.f32 %v850_v56, %v844_v45 }
 0x20d   : > { %v855_v18 = vadd.f32 %v853_v58, %v836_v4 }
 0x20f   : > { %v857_v36 = vpop.permute.xlu1 %856 }
 0x210   : > { %v860_v1 = vsel %vm598_vm7, %v857_v36, %v859_v25  ;;  %v861_v10 = vsel %vm598_vm7, %v859_v25, %v857_v36  ;;  %v898_v25 = vpop.permute.xlu2 %897 }
 0x211   : > { %v862_v8 = vmul.f32 %v860_v1, %v604_v9  ;;  %v863_v2 = vmul.f32 %v861_v10, %v605_v55  ;;  %v854_v9 = vadd.f32 %v852_v13, %v835_v14 }
 0x213   : > { %v871_v16 = vmul.f32 %v869_v3, %v862_v8  ;;  %v872_v59 = vmul.f32 %v869_v3, %v863_v2 }
 0x215   : > { %v873_v5 = vadd.f32 %v871_v16, %v854_v9  ;;  %v874_v51 = vadd.f32 %v872_v59, %v855_v18 }
 0x217   : > { %v876_v7 = vpop.permute.xlu1 %875 }
 0x218   : > { %v879_v15 = vsel %vm634_vm8, %v876_v7, %v878_v49  ;;  %v880_v27 = vsel %vm634_vm8, %v878_v49, %v876_v7 }
 0x219   : > { %v881_v32 = vmul.f32 %v879_v15, %v640_v30  ;;  %v882_v55 = vmul.f32 %v880_v27, %v641_v31  ;;  %v909_v30 = vpop.permute.xlu0 %908 }
 0x21f   : > { %v888_v20 = vpop.permute.xlu1 %887 }
 0x220   : > { %v890_v22 = vmul.f32 %v888_v20, %v881_v32  ;;  %v891_v24 = vmul.f32 %v888_v20, %v882_v55 }
 0x222   : > { %v892_v50 = vadd.f32 %v890_v22, %v873_v5  ;;  %v893_v54 = vadd.f32 %v891_v24, %v874_v51 }
 0x224   : > { %v900_v26 = vadd.f32 %v898_v25, %v892_v50  ;;  %v901_v62 = vadd.f32 %v898_v25, %v893_v54 }
 0x226   : > { %v902_v11 = vmax.f32 %v900_v26, 0.0  ;;  %v903_v28 = vmax.f32 %v901_v62, 0.0 }
 0x228   : > { %930 = vmatpush.msra.mxu2 %v902_v11  ;;  %950 = vmatpush.msra.mxu3 %v903_v28 }
 0x229   : > { %1069 = vmatmul.msk.f32.vlgmr.msra.gmra.mxu2 %vm911_vm10, %v904_v43  ;;  %1070 = vmatmul.msk.f32.vlgmr.msra.gmra.mxu3 %vm911_vm10, %v904_v43 }
 0x2ac   : > { %v932_v31 = vpop.f32.mrf.mxu2  ;;  %v952_v36 = vpop.f32.mrf.mxu3 }
 0x2ad   : > { %v933_v6 = vadd.f32 %v932_v31, %v909_v30  ;;  %v953_v52 = vadd.f32 %v952_v36, %v909_v30 }
 0x2af   : > { %v955_v56 = vmax.f32 %v933_v6, 0.0  ;;  %v956_v38 = vmax.f32 %v953_v52, 0.0 }
 0x2b1   : > { %957 = vst [vmem:[%s352_s21] sm:$0xff] %v955_v56 }
 0x2b2   : > { %958 = vst [vmem:[%s352_s21 + $0x8] sm:$0xff] %v956_v38 }
 0x2b3   : > { %1157 = shalt.err (!%p1154_p3)
}
 0x2b4   : > { %1078 = dma.vmem_to_hbm [thread:$0]  (%p1297_p5), %s974_s11, 256, %s976_s28, %s960_s17  }
 0x2b5 PF: > { %p1084_p4 = scmp.ge.s32.totalorder %s1192_s16, 2  ;;  %s987_s18 = sand.u32 1, %s1180_s13  }
 0x2b6   : > { %s988_s21 = scalar_lea.sflag [#allocation3], %s987_s18 }
 0x2b7   : > { %p1081_p7 = pnand %p1084_p4, %p1301_p6 }
 0x2b9   : > { %p1082_p8 = pneg %p1081_p7 }
 0x2bb   : > { %1175 = dma.done.wait (%p1082_p8), %s988_s21, 256  }
 0x2bc   : > { %1177 = vsyncadd (%p1082_p8), %s988_s21, 4294967040  ;;  %p20_p9 = scmp.ge.s32.totalorder %s1284_s19, 4   ;;  %s1766_s13 = smov %s1184_s14 }
 0x2bd   : > { %s1767_s14 = smov %s1188_s15  ;;  %s1768_s15 = smov %s1295_s22 }
 0x2be   : > { %s1769_s16 = smov %s1284_s19  ;;  %22 = sbr.rel (!%p20_p9) target bundleno = 3 (0x3), region = 118 }
 0x2c3   :  { %994 = vsyncpa [#allocation3], 1 }
 0x2c4   :  { %996 = vsyncpa [#allocation3 + $0x1], 1 }

</bundles_post_ra>
